<compile_context>
chip_gen: v5e
topology: v5e:2x2
jax: 0.10.0
libtpu: 0.0.40
codegen_flags: <defaults>
</compile_context>

<pallas_src>
import functools

import jax
import jax.numpy as jnp
from jax.experimental import pallas as pl
from jax.experimental.pallas import tpu as pltpu


def _round_up(x, m):
    return ((x + m - 1) // m) * m


def _sublane(dtype):
    """Rows packed per sublane word: 8 (f32), 16 (bf16), 32 (int8/fp8)."""
    return 32 // jnp.dtype(dtype).itemsize


def _vmem_limit_bytes():
    """Generation-aware scoped-VMEM budget, with headroom below physical."""
    try:
        cap = pltpu.get_tpu_info().vmem_capacity_bytes
    except Exception:
        cap = 64 * 1024 * 1024            # conservative: v7x physical VMEM
    # ~3/4 of physical, clamped to [32, 96] MiB: 48 MiB on v7x, 96 MiB on v5e/v6e.
    return max(32 * 1024 * 1024, min((cap * 3) // 4, 96 * 1024 * 1024))


def _linear_kernel_1pass(x_ref, w_ref, b_ref, o_ref):
    """Single-pass tile: full K in one block, no accumulator scratch.

    x_ref: (tm, Kp)   w_ref: (Kp, tn)   b_ref: (1, tn)   o_ref: (tm, tn)
    """
    acc = jnp.dot(x_ref[...], w_ref[...], preferred_element_type=jnp.float32)
    o_ref[...] = (acc + b_ref[...].astype(jnp.float32)).astype(o_ref.dtype)


def _linear_kernel_kloop(x_ref, w_ref, b_ref, o_ref, acc_ref):
    """K-tiled tile: accumulate over the (last, 'arbitrary') k grid axis.

    x_ref: (tm, tk)   w_ref: (tk, tn)   b_ref: (1, tn)
    o_ref: (tm, tn)   acc_ref: (tm, tn) f32, resident across k.
    """
    k = pl.program_id(2)

    @pl.when(k == 0)
    def _():
        # Seed the accumulator with the bias: saves a (tm, tn) add at finalize.
        acc_ref[...] = jnp.broadcast_to(
            b_ref[...].astype(jnp.float32), acc_ref.shape)

    acc_ref[...] += jnp.dot(x_ref[...], w_ref[...],
                            preferred_element_type=jnp.float32)

    @pl.when(k == pl.num_programs(2) - 1)
    def _():
        o_ref[...] = acc_ref[...].astype(o_ref.dtype)


@functools.partial(jax.jit,
                   static_argnames=("tm", "tn", "tk", "compute_dtype"))
def input_linears(x, weight, bias, *, tm=512, tn=1024, tk=1024,
                  compute_dtype=None):
    """Pallas equivalent of nn.Linear(real_dimension, d_model)(x).

    x:      (..., real_dimension)
    weight: (d_model, real_dimension)   -- PyTorch layout
    bias:   (d_model,)
    compute_dtype: optional MXU input dtype (e.g. jnp.bfloat16) fast path;
                   accumulation and bias add stay f32, output keeps x.dtype.
    returns (..., d_model)
    """
    *lead, K = x.shape
    N, K_w = weight.shape
    assert K_w == K, "weight must be (d_model, real_dimension)"
    M = 1
    for d in lead:
        M *= d

    out_dtype = x.dtype
    x2 = x.reshape(M, K)
    # One-time (K, N) transpose in HBM (amortized for static weights); the
    # kernel then contracts the natural way with no in-loop XLU transposes.
    w = weight.T
    b2 = bias.reshape(1, N)

    if compute_dtype is not None:
        x2 = x2.astype(compute_dtype)
        w = w.astype(compute_dtype)

    # Dtype-aware sublane alignment (covers both MXU inputs and f32 output).
    sub = max(_sublane(x2.dtype), _sublane(out_dtype))

    # Clamp tiles to the aligned problem size.
    tm = min(tm, _round_up(M, sub))
    tn = min(tn, _round_up(N, 128))
    tk = min(tk, _round_up(K, 128))

    # Megacore occupancy: aim for >= 2 parallel (i, j) tiles so v7x's two
    # TensorCores both get work (prefer splitting N; fall back to M).
    if (_round_up(M, sub) // tm) * (_round_up(N, 128) // tn) < 2:
        if tn > 128:
            tn = _round_up(tn // 2, 128)
        elif tm > sub and _round_up(M, sub) > sub:
            tm = _round_up(max(tm // 2, sub), sub)

    Mp = _round_up(M, tm)
    Np = _round_up(N, tn)
    Kp = _round_up(K, tk)
    k_steps = Kp // tk

    # Zero-pad to tile multiples (zeros contribute nothing to the matmul);
    # output is sliced back below. Keeps every store lane-dense/unmasked.
    if (Mp, Kp) != (M, K):
        x2 = jnp.pad(x2, ((0, Mp - M), (0, Kp - K)))
    if (Kp, Np) != (K, N):
        w = jnp.pad(w, ((0, Kp - K), (0, Np - N)))
    if Np != N:
        b2 = jnp.pad(b2, ((0, 0), (0, Np - N)))

    vmem_limit = _vmem_limit_bytes()

    in_item = jnp.dtype(x2.dtype).itemsize
    out_item = jnp.dtype(out_dtype).itemsize
    flops = 2 * M * N * K
    # Account for re-streaming: x is read (Np // tn) times, w and bias are
    # read (Mp // tm) times, the output is written once.
    bytes_accessed = (Mp * Kp * in_item * (Np // tn)
                      + Kp * Np * in_item * (Mp // tm)
                      + Np * jnp.dtype(b2.dtype).itemsize * (Mp // tm)
                      + Mp * Np * out_item)
    cost = pl.CostEstimate(flops=flops, transcendentals=0,
                           bytes_accessed=bytes_accessed)

    if k_steps == 1:
        # Fast path: whole reduction is one MXU pass per output tile.
        out = pl.pallas_call(
            _linear_kernel_1pass,
            out_shape=jax.ShapeDtypeStruct((Mp, Np), out_dtype),
            grid_spec=pltpu.PrefetchScalarGridSpec(
                num_scalar_prefetch=0,
                grid=(Mp // tm, Np // tn),
                in_specs=[
                    pl.BlockSpec((tm, Kp), lambda i, j: (i, 0)),   # activations
                    pl.BlockSpec((Kp, tn), lambda i, j: (0, j)),   # weight (K, N)
                    pl.BlockSpec((1, tn), lambda i, j: (0, j)),    # bias
                ],
                out_specs=pl.BlockSpec((tm, tn), lambda i, j: (i, j)),
            ),
            compiler_params=pltpu.CompilerParams(
                dimension_semantics=("parallel", "parallel"),
                vmem_limit_bytes=vmem_limit,
            ),
            cost_estimate=cost,
        )(x2, w, b2)
    else:
        out = pl.pallas_call(
            _linear_kernel_kloop,
            out_shape=jax.ShapeDtypeStruct((Mp, Np), out_dtype),
            grid_spec=pltpu.PrefetchScalarGridSpec(
                num_scalar_prefetch=0,
                grid=(Mp // tm, Np // tn, k_steps),
                in_specs=[
                    pl.BlockSpec((tm, tk), lambda i, j, k: (i, k)),  # activations
                    pl.BlockSpec((tk, tn), lambda i, j, k: (k, j)),  # weight (K, N)
                    pl.BlockSpec((1, tn), lambda i, j, k: (0, j)),   # bias
                ],
                out_specs=pl.BlockSpec((tm, tn), lambda i, j, k: (i, j)),
                scratch_shapes=[pltpu.VMEM((tm, tn), jnp.float32)],
            ),
            compiler_params=pltpu.CompilerParams(
                dimension_semantics=("parallel", "parallel", "arbitrary"),
                vmem_limit_bytes=vmem_limit,
            ),
            cost_estimate=cost,
        )(x2, w, b2)

    if (Mp, Np) != (M, N):
        out = out[:M, :N]
    return out.reshape(*lead, N)


if __name__ == "__main__":
    # Small shapes consistent with the module: (batch, seq, real_dimension)
    batch, seq, real_dimension, d_model = 2, 8, 32, 64

    key = jax.random.PRNGKey(0)
    kx, kw, kb = jax.random.split(key, 3)

    x = jax.random.normal(kx, (batch, seq, real_dimension), dtype=jnp.float32)
    # Deterministic parameter init (mimics nn.Linear's uniform(-1/sqrt(K), 1/sqrt(K)))
    bound = 1.0 / (real_dimension ** 0.5)
    weight = jax.random.uniform(
        kw, (d_model, real_dimension), minval=-bound, maxval=bound,
        dtype=jnp.float32)
    bias = jax.random.uniform(
        kb, (d_model,), minval=-bound, maxval=bound, dtype=jnp.float32)

    ref = x @ weight.T + bias

    # Default f32 path: must match the PyTorch/plain-JAX reference closely.
    out = input_linears(x, weight, bias)
    jax.block_until_ready(out)
    assert out.shape == (batch, seq, d_model)
    assert jnp.allclose(out, ref, atol=1e-5, rtol=1e-5)

    # bf16 MXU fast path (f32 accumulation kept): looser tolerance by design.
    out_bf16 = input_linears(x, weight, bias, compute_dtype=jnp.bfloat16)
    jax.block_until_ready(out_bf16)
    assert out_bf16.shape == (batch, seq, d_model)
    assert jnp.allclose(out_bf16, ref, atol=2e-2, rtol=2e-2)

    print("KERNEL_OK")
</pallas_src>

<mosaic_0001>
module attributes {stable_mosaic.version = 11 : i64} {
  func.func @_linear_kernel_1pass(%arg0: i32, %arg1: i32, %arg2: memref<8x128xf32, #tpu.memory_space<vmem>>, %arg3: memref<128x128xf32, #tpu.memory_space<vmem>>, %arg4: memref<1x128xf32, #tpu.memory_space<vmem>>, %arg5: memref<8x128xf32, #tpu.memory_space<vmem>>) attributes {dimension_semantics = [#tpu.dimension_semantics<parallel>, #tpu.dimension_semantics<parallel>], iteration_bounds = array<i64: 2, 1>, scalar_prefetch = 0 : i64, scratch_operands = 0 : i64, tpu.core_type = #tpu.core_type<tc>, window_params = [{transform_indices = @transform_0, window_bounds = array<i64: 8, 128>}, {transform_indices = @transform_1, window_bounds = array<i64: 128, 128>}, {transform_indices = @transform_2, window_bounds = array<i64: 1, 128>}, {transform_indices = @transform_3, window_bounds = array<i64: 8, 128>}]} {
    %c0 = arith.constant 0 : index
    %c0_0 = arith.constant 0 : index
    %0 = vector.load %arg2[%c0, %c0_0] : memref<8x128xf32, #tpu.memory_space<vmem>>, vector<8x128xf32>
    %c0_1 = arith.constant 0 : index
    %c0_2 = arith.constant 0 : index
    %1 = vector.load %arg3[%c0_1, %c0_2] : memref<128x128xf32, #tpu.memory_space<vmem>>, vector<128x128xf32>
    %cst = arith.constant dense<0.000000e+00> : vector<8x128xf32>
    %2 = tpu.matmul %0, %1, %cst {dimension_numbers = #tpu.dot_dimension_numbers<[1], [0], [0], [1], [0, 0, 1, 1], [], []>} : vector<8x128xf32>, vector<128x128xf32>, vector<8x128xf32> -> vector<8x128xf32>
    %c0_3 = arith.constant 0 : index
    %c0_4 = arith.constant 0 : index
    %3 = vector.load %arg4[%c0_3, %c0_4] : memref<1x128xf32, #tpu.memory_space<vmem>>, vector<1x128xf32>
    %4 = vector.broadcast %3 : vector<1x128xf32> to vector<8x128xf32>
    %5 = arith.addf %2, %4 : vector<8x128xf32>
    %c0_5 = arith.constant 0 : index
    %c0_6 = arith.constant 0 : index
    %6 = vector.load %arg5[%c0_5, %c0_6] : memref<8x128xf32, #tpu.memory_space<vmem>>, vector<8x128xf32>
    tpu.vector_store %arg5[%c0_5, %c0_6], %5 {strides = array<i32>} : memref<8x128xf32, #tpu.memory_space<vmem>>, vector<8x128xf32>,
    return
  }
  func.func @transform_0(%arg0: i32, %arg1: i32) -> (i32, i32) {
    %c0_i32 = arith.constant 0 : i32
    %c0_i32_0 = arith.constant 0 : i32
    return %arg0, %c0_i32 : i32, i32
  }
  func.func @transform_1(%arg0: i32, %arg1: i32) -> (i32, i32) {
    %c0_i32 = arith.constant 0 : i32
    %c0_i32_0 = arith.constant 0 : i32
    return %c0_i32, %arg1 : i32, i32
  }
  func.func @transform_2(%arg0: i32, %arg1: i32) -> (i32, i32) {
    %c0_i32 = arith.constant 0 : i32
    %c0_i32_0 = arith.constant 0 : i32
    return %c0_i32, %arg1 : i32, i32
  }
  func.func @transform_3(%arg0: i32, %arg1: i32) -> (i32, i32) {
    %c0_i32 = arith.constant 0 : i32
    return %arg0, %arg1 : i32, i32
  }
}

</mosaic_0001>

<bundles_post_ra>
// kernel: input_linears.1
= control target key start
LH: loop header
LB: loop body
LE: loop exit
PB: predicated region body
PF: predicated region fallthrough
CT: control target
= control target key end

     0   :  { %s438_s12 = smov 0   ;;  %s440_s13 = smov 0   ;;  %s526_s0 = inlined_call_operand.vmem [shape: f32[16,128], index: 0, kind: input, shape index: {}]   ;;  %s527_s1 = inlined_call_operand.vmem [shape: f32[128,128], index: 1, kind: input, shape index: {}]   ;;  %s528_s2 = inlined_call_operand.vmem [shape: f32[1,128], index: 2, kind: input, shape index: {}]   ;;  %s529_s3 = inlined_call_operand.vmem [shape: f32[16,128], index: 3, kind: output, shape index: {}]  }
   0x1   :  { %s442_s14 = smov 0  }
   0x2 LB: > { %s25_s15 = sadd.s32 1, %s412_s13  ;;  %p364_p0 = scmp.ge.s32.totalorder %s416_s14, 1  ;;  %s416_s14 = sphi %s442_s14, %s13_s14   ;;  %s412_s13 = sphi %s440_s13, %s531_s13   ;;  %s408_s12 = sphi %s438_s12, %s530_s12  }
   0x3   : > { %p27_p1 = scmp.ge.s32.totalorder %s25_s15, 2  ;;  %p167_p2 = scmp.lt.s32.totalorder %s416_s14, 3 }
   0x5   : > { %s533_s15 = smov (%p27_p1, %s25_s15), 0  ;;  %p168_p3 = pnand %p364_p0, %p167_p2 }
   0x6   : > { %p199_p4 = scmp.lt.s32.totalorder (!%p168_p3), %s408_s12, 1 }
   0x7   : > { %171 = sbr.rel (%p168_p3) target bundleno = 173 (0xad), region = 32 }
   0xc   : > { %v233_v0 = vld [vmem:[%s527_s1 + $0x78] sm:$0xff]  ;;  %v232_v1 = vld [vmem:[%s527_s1 + $0x70] sm:$0xff]  ;;  %v231_v2 = vld [vmem:[%s527_s1 + $0x68] sm:$0xff]  ;;  %s535_s12 = smov (!%p199_p4, %s408_s12), 1 }
   0xd   : > { %238 = vmatpush.msra.mxu0 %v233_v0  ;;  %v230_v3 = vld [vmem:[%s527_s1 + $0x60] sm:$0xff]  ;;  %v229_v4 = vld [vmem:[%s527_s1 + $0x58] sm:$0xff]  ;;  %v228_v5 = vld [vmem:[%s527_s1 + $0x50] sm:$0xff]  ;;  %s365_s19 = sshll.u32 %s535_s12, 3 }
   0xe   : > { %v227_v6 = vld [vmem:[%s527_s1 + $0x48] sm:$0xff]  ;;  %v226_v7 = vld [vmem:[%s527_s1 + $0x40] sm:$0xff]  ;;  %v225_v8 = vld [vmem:[%s527_s1 + $0x38] sm:$0xff]  ;;  %s202_s26 = scalar_lea.vmem %s526_s0, %s365_s19  ;;  %s216_s5 = scalar_lea.vmem %s529_s3, %s365_s19 }
   0xf   : > { %239 = vmatpush.msra.mxu0 %v232_v1  ;;  %v224_v9 = vld [vmem:[%s527_s1 + $0x30] sm:$0xff]  ;;  %v223_v10 = vld [vmem:[%s527_s1 + $0x28] sm:$0xff]  ;;  %v222_v11 = vld [vmem:[%s527_s1 + $0x20] sm:$0xff] }
  0x10   : > { %v221_v12 = vld [vmem:[%s527_s1 + $0x18] sm:$0xff]  ;;  %v220_v13 = vld [vmem:[%s527_s1 + $0x10] sm:$0xff]  ;;  %v219_v14 = vld [vmem:[%s527_s1 + $0x8] sm:$0xff] }
  0x11   : > { %240 = vmatpush.msra.mxu0 %v231_v2  ;;  %v218_v15 = vld [vmem:[%s527_s1] sm:$0xff] }
  0x12   : > { %v217_v16 = vld [vmem:[%s202_s26] sm:$0xff] }
  0x13   : > { %241 = vmatpush.msra.mxu0 %v230_v3  ;;  %v393_v17 = vld [vmem:[%s528_s2] ss:$0 sm:$0xff] }
  0x15   : > { %242 = vmatpush.msra.mxu0 %v229_v4 }
  0x17   : > { %243 = vmatpush.msra.mxu0 %v228_v5 }
  0x19   : > { %244 = vmatpush.msra.mxu0 %v227_v6 }
  0x1b   : > { %245 = vmatpush.msra.mxu0 %v226_v7 }
  0x1d   : > { %246 = vmatpush.msra.mxu0 %v225_v8 }
  0x1f   : > { %247 = vmatpush.msra.mxu0 %v224_v9 }
  0x21   : > { %248 = vmatpush.msra.mxu0 %v223_v10 }
  0x23   : > { %249 = vmatpush.msra.mxu0 %v222_v11 }
  0x25   : > { %250 = vmatpush.msra.mxu0 %v221_v12 }
  0x27   : > { %251 = vmatpush.msra.mxu0 %v220_v13 }
  0x29   : > { %252 = vmatpush.msra.mxu0 %v219_v14 }
  0x2b   : > { %253 = vmatpush.msra.mxu0 %v218_v15 }
  0x2c   : > { %254 = vmatmul.f32.vlgmr.msra.gmra.mxu0 %v217_v16 }
  0xa9   : > { %v255_v18 = vpop.f32.mrf.mxu0 }
  0xaa   : > { %v256_v19 = vadd.f32 %v393_v17, %v255_v18 }
  0xac   : > { %258 = vst [vmem:[%s216_s5] sm:$0xff] %v256_v19 }
  0xad PF: > { %s13_s14 = sadd.s32 1, %s416_s14   ;;  %s530_s12 = smov %s412_s13 }
  0xae   : > { %p10_p5 = scmp.ge.s32.totalorder %s13_s14, 4   ;;  %s531_s13 = smov %s533_s15 }
  0xb0   :  { %12 = sbr.rel (!%p10_p5) target bundleno = 2 (0x2), region = 68 }

</bundles_post_ra>
